<compile_context>
chip_gen: v5e
topology: v5e:2x2
jax: 0.10.0
libtpu: 0.0.40
codegen_flags: <defaults>
</compile_context>

<pallas_src>
import functools

import jax
import jax.numpy as jnp
from jax.experimental import pallas as pl
from jax.experimental.pallas import tpu as pltpu

EPS = 1e-5  # nn.LayerNorm default

_VMEM_SLACK = 2 << 20  # headroom for compiler-internal scratch


def _round_down_mult(n, m):
    return max(m, (n // m) * m)


def _vmem_budget_bytes():
    """Generation-aware per-core VMEM budget (v5e/v6e ~108 MiB, v7x ~54 MiB)."""
    try:
        cap = int(pltpu.get_tpu_info().vmem_capacity_bytes)  # per TensorCore
    except Exception:
        cap = 64 << 20  # conservative fallback = v7x per-TC size
    return max(32 << 20, int(cap * 0.85))


def prepare_residual_params(w_pt, b, gamma, beta, compute_dtype=None):
    """One-time parameter prep (call OUTSIDE the per-step hot path).

    w_pt: PyTorch-convention nn.Linear weight [out, in]; stored transposed to
    (in, out) so the kernel computes x @ w directly.  If compute_dtype (e.g.
    jnp.bfloat16) is given, W is cast once here and the kernel casts the x
    tile to match -> full-rate bf16 MXU while LN / residual stay f32.
    """
    d = w_pt.shape[0]
    w = w_pt.T
    if compute_dtype is not None:
        w = w.astype(compute_dtype)
    return (w, b.reshape(1, d), gamma.reshape(1, d), beta.reshape(1, d))


def _residual_ln_kernel(x_ref, w_ref, b_ref, g_ref, be_ref, o_ref):
    """Resident-W path: y = x @ W + b ; out = x + LayerNorm(y) for one row tile."""
    x = x_ref[...]
    y = jnp.dot(x.astype(w_ref.dtype), w_ref[...],
                preferred_element_type=jnp.float32)
    y = y + b_ref[...].astype(jnp.float32)

    mu = jnp.mean(y, axis=-1, keepdims=True)
    c = y - mu
    var = jnp.mean(c * c, axis=-1, keepdims=True)
    normed = c * jax.lax.rsqrt(var + EPS)
    normed = (normed * g_ref[...].astype(jnp.float32)
              + be_ref[...].astype(jnp.float32))

    o_ref[...] = (x.astype(jnp.float32) + normed).astype(o_ref.dtype)


def _residual_ln_ktiled_kernel(x_ref, w_ref, b_ref, g_ref, be_ref, o_ref,
                               acc_ref, *, tk):
    """Large-D path: W streamed in (tk, D) slices, f32 accumulator, epilogue at last k."""
    k = pl.program_id(1)

    @pl.when(k == 0)
    def _():
        acc_ref[...] = jnp.zeros_like(acc_ref)

    off = pl.multiple_of(k * tk, tk)
    xk = x_ref[:, pl.ds(off, tk)]
    acc_ref[...] += jnp.dot(xk.astype(w_ref.dtype), w_ref[...],
                            preferred_element_type=jnp.float32)

    @pl.when(k == pl.num_programs(1) - 1)
    def _():
        y = acc_ref[...] + b_ref[...].astype(jnp.float32)
        mu = jnp.mean(y, axis=-1, keepdims=True)
        c = y - mu
        var = jnp.mean(c * c, axis=-1, keepdims=True)
        normed = c * jax.lax.rsqrt(var + EPS)
        normed = (normed * g_ref[...].astype(jnp.float32)
                  + be_ref[...].astype(jnp.float32))
        o_ref[...] = (x_ref[...].astype(jnp.float32) + normed).astype(o_ref.dtype)


def residual_forward(x, w, b2, g2, be2, *, tm=None, tk=None,
                     force_k_tiling=False):
    """x: [B, S, D]; (w, b2, g2, be2) from prepare_residual_params."""
    B, S, D = x.shape
    rows = B * S
    in_b = jnp.dtype(x.dtype).itemsize
    w_b = jnp.dtype(w.dtype).itemsize
    budget = _vmem_budget_bytes()

    # Per-row VMEM cost: double-buffered x and out tiles + f32 LN temporaries.
    per_row = 2 * D * in_b * 2 + 16 * D
    resident_fixed = 2 * D * D * w_b + 6 * D * 4 + _VMEM_SLACK  # W double-buffered

    use_ktile = force_k_tiling or (resident_fixed + 8 * per_row > budget)
    if use_ktile and D % 128 != 0 and not force_k_tiling:
        # TODO(synk): K-tiling needs a 128-aligned feature axis; for very large
        # non-aligned D, pad the feature axis host-side (or single-buffer the
        # resident W) -- unusual corner, keep the resident path here.
        use_ktile = False

    if use_ktile:
        per_row += 4 * D  # resident f32 accumulator
        if tk is None:
            tk = 128
            for cand in (1024, 512, 256):
                if D % cand == 0 and (2 * cand * D * w_b + 6 * D * 4
                                      + _VMEM_SLACK + 8 * per_row) <= budget:
                    tk = cand
                    break
        assert D % tk == 0, "K-tile must divide the feature dim"
        fixed = 2 * tk * D * w_b + 6 * D * 4 + _VMEM_SLACK
    else:
        fixed = resident_fixed

    if tm is None:
        tm = int(max((budget - fixed) // per_row, 8))
    tm = int(min(tm, 1024, rows))
    tm = rows if tm >= rows else _round_down_mult(tm, 8)
    grid_m = pl.cdiv(rows, tm)

    x2 = x.reshape(rows, D)  # contiguous reshape; no HBM copy under XLA

    cost = pl.CostEstimate(
        flops=2 * rows * D * D,
        transcendentals=rows,
        bytes_accessed=2 * rows * D * in_b + D * D * w_b + 3 * D * 4,
    )
    params = pltpu.CompilerParams(
        dimension_semantics=(("parallel", "arbitrary") if use_ktile
                             else ("parallel",)),
        vmem_limit_bytes=int(budget),
    )

    if use_ktile:
        out = pl.pallas_call(
            functools.partial(_residual_ln_ktiled_kernel, tk=tk),
            out_shape=jax.ShapeDtypeStruct((rows, D), x.dtype),
            grid_spec=pltpu.PrefetchScalarGridSpec(
                num_scalar_prefetch=0,
                grid=(grid_m, D // tk),
                in_specs=[
                    pl.BlockSpec((tm, D), lambda i, k: (i, 0)),   # x row tile
                    pl.BlockSpec((tk, D), lambda i, k: (k, 0)),   # W K-slice
                    pl.BlockSpec((1, D), lambda i, k: (0, 0)),    # b
                    pl.BlockSpec((1, D), lambda i, k: (0, 0)),    # gamma
                    pl.BlockSpec((1, D), lambda i, k: (0, 0)),    # beta
                ],
                out_specs=pl.BlockSpec((tm, D), lambda i, k: (i, 0)),
                scratch_shapes=[pltpu.VMEM((tm, D), jnp.float32)],
            ),
            compiler_params=params,
            cost_estimate=cost,
        )(x2, w, b2, g2, be2)
    else:
        out = pl.pallas_call(
            _residual_ln_kernel,
            out_shape=jax.ShapeDtypeStruct((rows, D), x.dtype),
            grid_spec=pltpu.PrefetchScalarGridSpec(
                num_scalar_prefetch=0,
                grid=(grid_m,),
                in_specs=[
                    pl.BlockSpec((tm, D), lambda i: (i, 0)),      # x row tile
                    pl.BlockSpec((D, D), lambda i: (0, 0)),       # W (resident)
                    pl.BlockSpec((1, D), lambda i: (0, 0)),       # b
                    pl.BlockSpec((1, D), lambda i: (0, 0)),       # gamma
                    pl.BlockSpec((1, D), lambda i: (0, 0)),       # beta
                ],
                out_specs=pl.BlockSpec((tm, D), lambda i: (i, 0)),
            ),
            compiler_params=params,
            cost_estimate=cost,
        )(x2, w, b2, g2, be2)

    return out.reshape(B, S, D)


def residual_reference(x, w_pt, b, gamma, beta):
    """Pure-JAX reference matching the PyTorch module semantics."""
    y = jnp.einsum("bsd,od->bso", x, w_pt) + b          # nn.Linear
    mu = jnp.mean(y, axis=-1, keepdims=True)
    var = jnp.mean((y - mu) ** 2, axis=-1, keepdims=True)
    normed = (y - mu) / jnp.sqrt(var + EPS) * gamma + beta
    return x + normed


def _make_params(key, dim, dtype=jnp.float32):
    kw, kb, kg, kbe = jax.random.split(key, 4)
    w_pt = jax.random.normal(kw, (dim, dim), dtype=dtype) * (1.0 / dim ** 0.5)
    b = jax.random.normal(kb, (dim,), dtype=dtype) * 0.1
    gamma = 1.0 + 0.1 * jax.random.normal(kg, (dim,), dtype=dtype)
    beta = 0.1 * jax.random.normal(kbe, (dim,), dtype=dtype)
    return w_pt, b, gamma, beta


if __name__ == "__main__":
    key = jax.random.PRNGKey(0)

    # --- 1) Small config implied by the module (dim=32, seq=8, batch=2) -----
    B, S, D = 2, 8, 32
    kx, kp, key = jax.random.split(key, 3)
    x = jax.random.normal(kx, (B, S, D), dtype=jnp.float32)
    w_pt, b, g, be = _make_params(kp, D)
    pw = prepare_residual_params(w_pt, b, g, be)

    out = jax.block_until_ready(residual_forward(x, *pw))
    ref = residual_reference(x, w_pt, b, g, be)
    assert out.shape == (B, S, D)
    assert jnp.allclose(out, ref, atol=1e-4, rtol=1e-4), "mismatch (small cfg)"

    # --- 2) Ragged row blocks + non-128-aligned D, no host padding ----------
    B2, S2, D2 = 3, 100, 192          # rows=300, tm=128 -> ragged last block
    kx2, kp2, key = jax.random.split(key, 3)
    x2 = jax.random.normal(kx2, (B2, S2, D2), dtype=jnp.float32)
    w2, b2_, g2_, be2_ = _make_params(kp2, D2)
    pw2 = prepare_residual_params(w2, b2_, g2_, be2_)

    out2 = jax.block_until_ready(residual_forward(x2, *pw2, tm=128))
    ref2 = residual_reference(x2, w2, b2_, g2_, be2_)
    assert out2.shape == (B2, S2, D2)
    assert jnp.allclose(out2, ref2, atol=1e-3, rtol=1e-3), "mismatch (ragged cfg)"

    # --- 3) K-tiled large-D fallback (forced at small D for testing) --------
    B3, S3, D3 = 2, 64, 256
    kx3, kp3, key = jax.random.split(key, 3)
    x3 = jax.random.normal(kx3, (B3, S3, D3), dtype=jnp.float32)
    w3, b3_, g3_, be3_ = _make_params(kp3, D3)
    pw3 = prepare_residual_params(w3, b3_, g3_, be3_)

    out3 = jax.block_until_ready(
        residual_forward(x3, *pw3, tm=64, tk=128, force_k_tiling=True))
    ref3 = residual_reference(x3, w3, b3_, g3_, be3_)
    assert out3.shape == (B3, S3, D3)
    assert jnp.allclose(out3, ref3, atol=1e-3, rtol=1e-3), "mismatch (k-tiled cfg)"

    # --- 4) bf16 MXU operands (LN + residual stay f32) -----------------------
    pw3_bf16 = prepare_residual_params(w3, b3_, g3_, be3_,
                                       compute_dtype=jnp.bfloat16)
    out4 = jax.block_until_ready(residual_forward(x3, *pw3_bf16))
    assert jnp.allclose(out4, ref3, atol=1e-1, rtol=1e-1), "mismatch (bf16 cfg)"

    print("KERNEL_OK")
</pallas_src>

<mosaic_0001>
module attributes {stable_mosaic.version = 11 : i64} {
  func.func @_residual_ln_kernel(%arg0: i32, %arg1: memref<16x32xf32, #tpu.memory_space<vmem>>, %arg2: memref<32x32xf32, #tpu.memory_space<vmem>>, %arg3: memref<1x32xf32, #tpu.memory_space<vmem>>, %arg4: memref<1x32xf32, #tpu.memory_space<vmem>>, %arg5: memref<1x32xf32, #tpu.memory_space<vmem>>, %arg6: memref<16x32xf32, #tpu.memory_space<vmem>>) attributes {dimension_semantics = [#tpu.dimension_semantics<parallel>], iteration_bounds = array<i64: 1>, scalar_prefetch = 0 : i64, scratch_operands = 0 : i64, tpu.core_type = #tpu.core_type<tc>, window_params = [{transform_indices = @transform_0, window_bounds = array<i64: 16, 32>}, {pipeline_mode = #tpu.pipeline_mode<synchronous>, transform_indices = @transform_1, window_bounds = array<i64: 32, 32>}, {pipeline_mode = #tpu.pipeline_mode<synchronous>, transform_indices = @transform_2, window_bounds = array<i64: 1, 32>}, {pipeline_mode = #tpu.pipeline_mode<synchronous>, transform_indices = @transform_3, window_bounds = array<i64: 1, 32>}, {pipeline_mode = #tpu.pipeline_mode<synchronous>, transform_indices = @transform_4, window_bounds = array<i64: 1, 32>}, {transform_indices = @transform_5, window_bounds = array<i64: 16, 32>}]} {
    %c0 = arith.constant 0 : index
    %c0_0 = arith.constant 0 : index
    %0 = vector.load %arg1[%c0, %c0_0] : memref<16x32xf32, #tpu.memory_space<vmem>>, vector<16x32xf32>
    %c0_1 = arith.constant 0 : index
    %c0_2 = arith.constant 0 : index
    %1 = vector.load %arg2[%c0_1, %c0_2] : memref<32x32xf32, #tpu.memory_space<vmem>>, vector<32x32xf32>
    %cst = arith.constant dense<0.000000e+00> : vector<16x32xf32>
    %2 = tpu.matmul %0, %1, %cst {dimension_numbers = #tpu.dot_dimension_numbers<[1], [0], [0], [1], [0, 0, 1, 1], [], []>} : vector<16x32xf32>, vector<32x32xf32>, vector<16x32xf32> -> vector<16x32xf32>
    %c0_3 = arith.constant 0 : index
    %c0_4 = arith.constant 0 : index
    %3 = vector.load %arg3[%c0_3, %c0_4] : memref<1x32xf32, #tpu.memory_space<vmem>>, vector<1x32xf32>
    %4 = vector.broadcast %3 : vector<1x32xf32> to vector<16x32xf32>
    %5 = arith.addf %2, %4 : vector<16x32xf32>
    %cst_5 = arith.constant dense<0.000000e+00> : vector<16xf32>
    %6 = vector.multi_reduction <add>, %5, %cst_5 [1] : vector<16x32xf32> to vector<16xf32>
    %7 = vector.shape_cast %6 : vector<16xf32> to vector<16x1xf32>
    %cst_6 = arith.constant 3.200000e+01 : f32
    %8 = vector.broadcast %cst_6 : f32 to vector<16x1xf32>
    %9 = arith.divf %7, %8 : vector<16x1xf32>
    %10 = vector.broadcast %9 : vector<16x1xf32> to vector<16x32xf32>
    %11 = arith.subf %5, %10 : vector<16x32xf32>
    %12 = arith.mulf %11, %11 : vector<16x32xf32>
    %cst_7 = arith.constant dense<0.000000e+00> : vector<16xf32>
    %13 = vector.multi_reduction <add>, %12, %cst_7 [1] : vector<16x32xf32> to vector<16xf32>
    %14 = vector.shape_cast %13 : vector<16xf32> to vector<16x1xf32>
    %cst_8 = arith.constant 3.200000e+01 : f32
    %15 = vector.broadcast %cst_8 : f32 to vector<16x1xf32>
    %16 = arith.divf %14, %15 : vector<16x1xf32>
    %cst_9 = arith.constant 9.99999974E-6 : f32
    %17 = vector.broadcast %cst_9 : f32 to vector<16x1xf32>
    %18 = arith.addf %16, %17 : vector<16x1xf32>
    %19 = math.rsqrt %18 : vector<16x1xf32>
    %20 = vector.broadcast %19 : vector<16x1xf32> to vector<16x32xf32>
    %21 = arith.mulf %11, %20 : vector<16x32xf32>
    %c0_10 = arith.constant 0 : index
    %c0_11 = arith.constant 0 : index
    %22 = vector.load %arg4[%c0_10, %c0_11] : memref<1x32xf32, #tpu.memory_space<vmem>>, vector<1x32xf32>
    %23 = vector.broadcast %22 : vector<1x32xf32> to vector<16x32xf32>
    %24 = arith.mulf %21, %23 : vector<16x32xf32>
    %c0_12 = arith.constant 0 : index
    %c0_13 = arith.constant 0 : index
    %25 = vector.load %arg5[%c0_12, %c0_13] : memref<1x32xf32, #tpu.memory_space<vmem>>, vector<1x32xf32>
    %26 = vector.broadcast %25 : vector<1x32xf32> to vector<16x32xf32>
    %27 = arith.addf %24, %26 : vector<16x32xf32>
    %28 = arith.addf %0, %27 : vector<16x32xf32>
    %c0_14 = arith.constant 0 : index
    %c0_15 = arith.constant 0 : index
    %29 = vector.load %arg6[%c0_14, %c0_15] : memref<16x32xf32, #tpu.memory_space<vmem>>, vector<16x32xf32>
    tpu.vector_store %arg6[%c0_14, %c0_15], %28 {strides = array<i32>} : memref<16x32xf32, #tpu.memory_space<vmem>>, vector<16x32xf32>,
    return
  }
  func.func @transform_0(%arg0: i32) -> (i32, i32) {
    %c0_i32 = arith.constant 0 : i32
    %c0_i32_0 = arith.constant 0 : i32
    return %arg0, %c0_i32 : i32, i32
  }
  func.func @transform_1(%arg0: i32) -> (i32, i32) {
    %c0_i32 = arith.constant 0 : i32
    %c0_i32_0 = arith.constant 0 : i32
    %c0_i32_1 = arith.constant 0 : i32
    return %c0_i32, %c0_i32_0 : i32, i32
  }
  func.func @transform_2(%arg0: i32) -> (i32, i32) {
    %c0_i32 = arith.constant 0 : i32
    %c0_i32_0 = arith.constant 0 : i32
    %c0_i32_1 = arith.constant 0 : i32
    return %c0_i32, %c0_i32_0 : i32, i32
  }
  func.func @transform_3(%arg0: i32) -> (i32, i32) {
    %c0_i32 = arith.constant 0 : i32
    %c0_i32_0 = arith.constant 0 : i32
    %c0_i32_1 = arith.constant 0 : i32
    return %c0_i32, %c0_i32_0 : i32, i32
  }
  func.func @transform_4(%arg0: i32) -> (i32, i32) {
    %c0_i32 = arith.constant 0 : i32
    %c0_i32_0 = arith.constant 0 : i32
    %c0_i32_1 = arith.constant 0 : i32
    return %c0_i32, %c0_i32_0 : i32, i32
  }
  func.func @transform_5(%arg0: i32) -> (i32, i32) {
    %c0_i32 = arith.constant 0 : i32
    %c0_i32_0 = arith.constant 0 : i32
    return %arg0, %c0_i32 : i32, i32
  }
}

</mosaic_0001>

<bundles_post_ra>
// kernel: tpu_custom_call.1
= control target key start
LH: loop header
LB: loop body
LE: loop exit
PB: predicated region body
PF: predicated region fallthrough
CT: control target
= control target key end

     0   :  { %10 = vsyncpa [#allocation3], 0  ;;  %s358_s0 = inlined_call_operand.hbm [shape: f32[16,32], index: 0, kind: input, shape index: {}]   ;;  %s359_s1 = inlined_call_operand.hbm [shape: f32[32,32], index: 1, kind: input, shape index: {}]   ;;  %s360_s2 = inlined_call_operand.vmem [shape: f32[1,32], index: 2, kind: input, shape index: {}]   ;;  %s361_s3 = inlined_call_operand.vmem [shape: f32[1,32], index: 3, kind: input, shape index: {}]   ;;  %s362_s4 = inlined_call_operand.vmem [shape: f32[1,32], index: 4, kind: input, shape index: {}]   ;;  %s363_s5 = inlined_call_operand.hbm [shape: f32[16,32], index: 5, kind: output, shape index: {}]  }
   0x1   :  { %11 = vsyncpa [#allocation6], 0 }
   0x2   :  { %12 = vsyncpa [#allocation4], 0  ;;  %s17_s20 = sshll.u32 %s358_s0, 4  ;;  %s279_s21 = smov [#allocation2]   ;;  %s18_s20 = int_to_ptr.hbm [resolvable:$true] %s17_s20 }
   0x3   :  { %s19_s22 = sshll.u32 %s279_s21, 4  ;;  %s30_s25 = sshll.u32 %s359_s1, 4  ;;  %s20_s22 = int_to_ptr.vmem [resolvable:$true] %s19_s22  ;;  %s31_s25 = int_to_ptr.hbm [resolvable:$true] %s30_s25 }
   0x4   :  { %s280_s26 = smov 128   ;;  %s281_s27 = smov 8  }
   0x5   :  { %25 = dma.hbm_to_vmem [thread:$0]  %s18_s20, 256, %s20_s22, [#allocation3], %s280_s26, %s280_s26, %s281_s27  }
   0x6   :  { %s282_s28 = smov [#allocation5]  }
   0x7   :  { %s32_s29 = sshll.u32 %s282_s28, 4  ;;  %s33_s29 = int_to_ptr.vmem [resolvable:$true] %s32_s29 }
   0x8   :  { %38 = dma.hbm_to_vmem [thread:$0]  %s31_s25, 512, %s33_s29, [#allocation6], %s280_s26, %s280_s26, %s281_s27  }
   0x9   :  { %273 = dma.done.wait [#allocation3], 256  }
   0xa   :  { %274 = vsyncadd [#allocation3], 4294967040 }
   0xb   :  { %275 = dma.done.wait [#allocation6], 512  }
   0xc   :  { %276 = vsyncadd [#allocation6], 4294966784  ;;  %v58_v0 = vld [vmem:[#allocation5 + $0x18] sm:$0xff]  ;;  %v57_v1 = vld [vmem:[#allocation5 + $0x10] sm:$0xff]  ;;  %vm63_vm0 = vcmask 261120   ;;  %v283_v13 = vmov 32.0  }
   0xd   :  { %82 = vmatpush.msra.mxu0 %v58_v0  ;;  %182 = vmatpush.msra.mxu1 %v58_v0  ;;  %v56_v2 = vld [vmem:[#allocation5 + $0x8] sm:$0xff]  ;;  %v55_v3 = vld [vmem:[#allocation5] sm:$0xff]  ;;  %v327_v4 = vld [vmem:[#allocation2] sm:$0xff]  ;;  %195 = vrcp.f32 %v283_v13 }
   0xe   :  { %v329_v5 = vld [vmem:[#allocation2 + $0x8] sm:$0xff]  ;;  %v192_v6 = vld [vmem:[%s360_s2] ss:$0 sm:$0xff] }
   0xf   :  { %83 = vmatpush.msra.mxu0 %v57_v1  ;;  %183 = vmatpush.msra.mxu1 %v57_v1  ;;  %v193_v44 = vld [vmem:[%s361_s3] ss:$0 sm:$0xff]  ;;  %s284_s3 = smov [#allocation7]  }
  0x10   :  { %v194_v48 = vld [vmem:[%s362_s4] ss:$0 sm:$0xff]  ;;  %s164_s8 = sshll.u32 %s284_s3, 4  ;;  %s166_s4 = sshll.u32 %s363_s5, 4  ;;  %s165_s8 = int_to_ptr.vmem [resolvable:$true] %s164_s8  ;;  %s167_s4 = int_to_ptr.hbm [resolvable:$true] %s166_s4 }
  0x11   :  { %84 = vmatpush.msra.mxu0 %v56_v2  ;;  %184 = vmatpush.msra.mxu1 %v56_v2 }
  0x13   :  { %85 = vmatpush.msra.mxu0 %v55_v3  ;;  %185 = vmatpush.msra.mxu1 %v55_v3  ;;  %v196_v14 = vpop.eup %195 }
  0x14   :  { %180 = vmatmul.msk.f32.vlgmr.msra.gmra.mxu0 %vm63_vm0, %v327_v4  ;;  %181 = vmatmul.msk.f32.vlgmr.msra.gmra.mxu1 %vm63_vm0, %v329_v5  ;;  %v100_v15 = vmul.f32 32.0, %v196_v14  ;;  %vm104_vm1 = vweird.f32 %v196_v14 }
  0x16   :  { %v101_v16 = vsub.f32 1.0, %v100_v15 }
  0x18   :  { %v102_v17 = vmul.f32 %v196_v14, %v101_v16 }
  0x1a   :  { %v103_v18 = vadd.f32 %v196_v14, %v102_v17 }
  0x1c   :  { %v105_v19 = vsel %vm104_vm1, %v196_v14, %v103_v18 }
  0x91   :  { %v87_v7 = vpop.f32.mrf.mxu0  ;;  %v90_v9 = vpop.f32.mrf.mxu1 }
  0x92   :  { %v88_v8 = vadd.f32 %v192_v6, %v87_v7  ;;  %v91_v11 = vadd.f32 %v192_v6, %v90_v9 }
  0x94   :  { %v93_v10 = vsel %vm63_vm0, %v88_v8, 0.0  ;;  %v96_v12 = vsel %vm63_vm0, %v91_v11, 0.0 }
  0x95   :  { %94 = vadd.xlane.f32.xlu0 %v93_v10 }
  0x9d   :  { %97 = vadd.xlane.f32.xlu0 %v96_v12 }
 0x108   :  { %v95_v20 = vpop.xlane.xlu0 %94 }
 0x109   :  { %v106_v21 = vmul.f32 %v105_v19, %v95_v20 }
 0x10b   :  { %v108_v22 = vsub.f32 %v88_v8, %v106_v21 }
 0x10d   :  { %v110_v23 = vmul.f32 %v108_v22, %v108_v22 }
 0x10f   :  { %v112_v24 = vsel %vm63_vm0, %v110_v23, 0.0 }
 0x110   :  { %113 = vadd.xlane.f32.xlu1 %v112_v24  ;;  %v98_v25 = vpop.xlane.xlu0 %97 }
 0x111   :  { %v107_v26 = vmul.f32 %v105_v19, %v98_v25 }
 0x113   :  { %v109_v27 = vsub.f32 %v91_v11, %v107_v26 }
 0x115   :  { %v111_v28 = vmul.f32 %v109_v27, %v109_v27 }
 0x117   :  { %v115_v29 = vsel %vm63_vm0, %v111_v28, 0.0 }
 0x118   :  { %116 = vadd.xlane.f32.xlu1 %v115_v29 }
 0x183   :  { %v114_v30 = vpop.xlane.xlu1 %113 }
 0x184   :  { %v118_v31 = vmul.f32 %v114_v30, %v105_v19 }
 0x186   :  { %v120_v32 = vadd.f32 1e-05, %v118_v31 }
 0x188   :  { %197 = vrsqrt.f32 %v120_v32  ;;  %vm128_vm3 = vweird.f32 %v120_v32 }
 0x18b   :  { %v117_v33 = vpop.xlane.xlu1 %116 }
 0x18c   :  { %v119_v34 = vmul.f32 %v117_v33, %v105_v19 }
 0x18e   :  { %v198_v35 = vpop.eup %197  ;;  %v121_v36 = vadd.f32 1e-05, %v119_v34 }
 0x18f   :  { %v123_v37 = vmul.f32 %v198_v35, %v120_v32  ;;  %vm129_vm2 = vweird.f32 %v198_v35 }
 0x190   :  { %199 = vrsqrt.f32 %v121_v36  ;;  %vm130_vm4 = vmor %vm128_vm3, %vm129_vm2  ;;  %vm138_vm6 = vweird.f32 %v121_v36 }
 0x191   :  { %v124_v38 = vmul.f32 %v198_v35, %v123_v37 }
 0x193   :  { %v125_v39 = vmul.f32 0.5, %v124_v38 }
 0x195   :  { %v126_v40 = vsub.f32 1.5, %v125_v39 }
 0x196   :  { %v200_v41 = vpop.eup %199 }
 0x197   :  { %v127_v42 = vmul.f32 %v198_v35, %v126_v40  ;;  %v133_v43 = vmul.f32 %v200_v41, %v121_v36  ;;  %vm139_vm5 = vweird.f32 %v200_v41 }
 0x198   :  { %vm140_vm7 = vmor %vm138_vm6, %vm139_vm5 }
 0x199   :  { %v131_v45 = vsel %vm130_vm4, %v198_v35, %v127_v42  ;;  %v134_v46 = vmul.f32 %v200_v41, %v133_v43 }
 0x19a   :  { %v142_v47 = vmul.f32 %v131_v45, %v108_v22 }
 0x19b   :  { %v135_v49 = vmul.f32 0.5, %v134_v46 }
 0x19c   :  { %v148_v50 = vmul.f32 %v193_v44, %v142_v47 }
 0x19d   :  { %v136_v51 = vsub.f32 1.5, %v135_v49 }
 0x19e   :  { %v154_v52 = vadd.f32 %v194_v48, %v148_v50 }
 0x19f   :  { %v137_v53 = vmul.f32 %v200_v41, %v136_v51 }
 0x1a0   :  { %v156_v54 = vadd.f32 %v154_v52, %v327_v4 }
 0x1a1   :  { %v141_v55 = vsel %vm140_vm7, %v200_v41, %v137_v53 }
 0x1a2   :  { %v143_v56 = vmul.f32 %v141_v55, %v109_v27  ;;  %158 = vst.msk [vmem:[#allocation7] sm:$0xff] %vm63_vm0, %v156_v54 }
 0x1a4   :  { %v149_v57 = vmul.f32 %v193_v44, %v143_v56 }
 0x1a6   :  { %v155_v58 = vadd.f32 %v194_v48, %v149_v57 }
 0x1a8   :  { %v157_v59 = vadd.f32 %v155_v58, %v329_v5 }
 0x1aa   :  { %159 = vst.msk [vmem:[#allocation7 + $0x8] sm:$0xff] %vm63_vm0, %v157_v59 }
 0x1ab   :  { %172 = dma.vmem_to_hbm [thread:$0]  %s165_s8, 256, %s167_s4, [#allocation4], %s280_s26, %s280_s26, %s281_s27  }
 0x1ac   :  { %277 = dma.done.wait [#allocation4], 256  }
 0x1ad   :  { %278 = vsyncadd [#allocation4], 4294967040 }
 0x1ae   :  { %177 = vsyncpa [#allocation3], 1 }
 0x1af   :  { %178 = vsyncpa [#allocation6], 1 }
 0x1b0   :  { %179 = vsyncpa [#allocation4], 1 }

</bundles_post_ra>
